<compile_context>
chip_gen: v7x
topology: tpu7x:2x2x1
jax: 0.10.0
libtpu: 0.0.40
codegen_flags: <defaults>
</compile_context>

<pallas_src>
import math

import numpy as np
import jax
import jax.numpy as jnp
from jax.experimental import pallas as pl
from jax.experimental.pallas import tpu as pltpu

_LOG_2PI = float(np.log(2.0 * np.pi))

# Per-buffer streaming-tile target. 2 streams (z, out) x 2 pipeline buffers
# x 4 MiB = 16 MiB, comfortably inside the 48 MiB scoped-VMEM cap below.
_TILE_BYTES = 4 << 20
_VMEM_LIMIT = 48 << 20          # <= v7x's 64 MiB physical VMEM, with headroom
_MAX_LANE = 2048                # widest lane-packed row in the flattened path


def _normal_logprob_kernel(loc_ref, scale_ref, z_ref, out_ref):
    # Compute in f32 regardless of the input dtype; cast only on the store.
    loc = loc_ref[...].astype(jnp.float32)
    scale = scale_ref[...].astype(jnp.float32)
    z = z_ref[...].astype(jnp.float32)

    var = scale * scale
    # Parameter-only terms: when loc/scale arrive as a (1, L) broadcast block
    # these run on L elements per tile instead of tile_rows * L.
    log_term = -0.5 * (_LOG_2PI + jnp.log(var))
    inv_2var = 0.5 * pl.reciprocal(var, approx=False)  # exact; kernel is HBM-bound

    diff = z - loc
    out_ref[...] = (log_term - diff * diff * inv_2var).astype(out_ref.dtype)


def _round_up(x, m):
    return -(-x // m) * m


def _call_kernel(loc2, scale2, z2, out_dtype, tile_rows=None):
    """loc2/scale2: (1, L) or (R, L); z2: (R, L). L is a multiple of 128 (or full)."""
    R, L = z2.shape
    itemsize = max(jnp.dtype(z2.dtype).itemsize, jnp.dtype(out_dtype).itemsize)
    bytes_per_row = itemsize * L
    auto = tile_rows is None

    if auto:
        # ~4 MiB per streaming buffer, sublane dim a multiple of 8.
        tile_rows = max(8, (_TILE_BYTES // max(1, bytes_per_row)) // 8 * 8)
    else:
        tile_rows = max(8, _round_up(int(tile_rows), 8))

    if R <= tile_rows:
        tile_rows = R  # block == full array dims -> (8,128) rule satisfied

    # v7x megacore: don't collapse to a single grid step on non-tiny inputs,
    # otherwise the "parallel" axis can't shard across the 2 TensorCores and
    # there is no double-buffering either.
    if auto and tile_rows == R and R > 8 and R * bytes_per_row > (1 << 20):
        half = _round_up(-(-R // 2), 8)
        if half < R:
            tile_rows = max(8, half)

    grid = (pl.cdiv(R, tile_rows),)

    z_spec = pl.BlockSpec((tile_rows, L), lambda i: (i, 0))

    def param_spec(p):
        if p.shape[0] == 1:
            # Broadcast parameters: one (1, L) block reused for every row tile.
            return pl.BlockSpec((1, L), lambda i: (0, 0))
        return z_spec

    return pl.pallas_call(
        _normal_logprob_kernel,
        out_shape=jax.ShapeDtypeStruct((R, L), out_dtype),
        grid=grid,
        in_specs=[param_spec(loc2), param_spec(scale2), z_spec],
        out_specs=z_spec,
        compiler_params=pltpu.CompilerParams(
            dimension_semantics=("parallel",),
            vmem_limit_bytes=_VMEM_LIMIT,
        ),
    )(loc2, scale2, z2)


def _is_feature_only(shape, feat):
    """True if `shape` broadcasts against the output using only the last axis."""
    if len(shape) == 0:
        return True
    return all(d == 1 for d in shape[:-1]) and shape[-1] in (1, feat)


def normal_log_prob(loc, scale, z, *, tile_rows=None):
    """Elementwise Normal log-density, computed in a Pallas TPU kernel."""
    out_shape = jnp.broadcast_shapes(loc.shape, scale.shape, z.shape)
    out_dtype = jnp.result_type(loc.dtype, scale.dtype, z.dtype)
    if not jnp.issubdtype(out_dtype, jnp.floating):
        out_dtype = jnp.float32

    n_total = int(np.prod(out_shape)) if len(out_shape) else 1
    if n_total == 0:
        return jnp.zeros(out_shape, out_dtype)

    feat = int(out_shape[-1]) if len(out_shape) else 1
    rows = n_total // max(feat, 1)
    itemsize = max(jnp.dtype(z.dtype).itemsize, jnp.dtype(out_dtype).itemsize)

    z_b = z if z.shape == out_shape else jnp.broadcast_to(z, out_shape)

    feature_only = (len(out_shape) > 0
                    and _is_feature_only(loc.shape, feat)
                    and _is_feature_only(scale.shape, feat))

    if feature_only and rows >= 2:
        # --- Broadcast-aware path: keep loc/scale at (1, L). -----------------
        loc_v = jnp.broadcast_to(jnp.ravel(loc), (feat,))
        scale_v = jnp.broadcast_to(jnp.ravel(scale), (feat,))

        # Lane-dense layout: either feat is already a multiple of 128, or fold
        # g rows into one lane row (L = lcm(feat,128)), or pad the feature axis
        # to the next multiple of 128 (dense vst, no masked partial stores).
        g, feat_pad = 1, feat
        if feat % 128 != 0:
            cand = math.lcm(feat, 128) // feat
            if rows % cand == 0 and feat * cand <= _MAX_LANE:
                g = cand
            else:
                feat_pad = _round_up(feat, 128)
        L = feat_pad * g
        R = rows // g

        # Keep the minimum (8, L) tile inside the streaming budget; otherwise
        # fall through to the flattened path (which bounds L at _MAX_LANE and
        # avoids oversized single blocks / VMEM OOM).
        if min(R, 8) * L * itemsize <= _TILE_BYTES:
            if g > 1:
                loc2 = jnp.tile(loc_v, g).reshape(1, L)
                scale2 = jnp.tile(scale_v, g).reshape(1, L)
                z2 = z_b.reshape(R, L)
            elif feat_pad != feat:
                pad = feat_pad - feat
                loc2 = jnp.pad(loc_v, (0, pad)).reshape(1, L)
                scale2 = jnp.pad(scale_v, (0, pad), constant_values=1).reshape(1, L)
                z2 = jnp.pad(z_b.reshape(rows, feat), ((0, 0), (0, pad)))
            else:
                loc2 = loc_v.reshape(1, L)
                scale2 = scale_v.reshape(1, L)
                z2 = z_b.reshape(R, L)

            out2 = _call_kernel(loc2, scale2, z2, out_dtype, tile_rows=tile_rows)
            if feat_pad != feat:
                out2 = out2[:, :feat]
            return out2.reshape(out_shape)

    # --- Fallback: flatten lane-dense; materialize broadcasts. ---------------
    # TODO(synk): when loc/scale broadcast over leading/middle axes (e.g. (B,1,H))
    # this still materializes two full-size arrays; expressing the reuse via the
    # BlockSpec index_map would keep the kernel at ~2 HBM streams.
    loc_b = jnp.broadcast_to(loc, out_shape)
    scale_b = jnp.broadcast_to(scale, out_shape)

    L = None
    n_pad = n_total
    for cand in range(_MAX_LANE, 127, -128):   # largest 128-multiple divisor
        if n_total % cand == 0:
            L = cand
            break
    if L is None:
        # No lane-dense divisor: pad the flattened stream instead of running
        # with masked partial stores / narrow DMAs.
        L = 512 if n_total >= 512 else 128
        n_pad = _round_up(n_total, L)

    def _flat(a, fill):
        a = jnp.ravel(a)
        if n_pad != n_total:
            a = jnp.pad(a, (0, n_pad - n_total), constant_values=fill)
        return a.reshape(n_pad // L, L)

    z2 = _flat(z_b, 0)
    loc2 = _flat(loc_b, 0)
    scale2 = _flat(scale_b, 1)   # keep var finite in the padded tail

    out2 = _call_kernel(loc2, scale2, z2, out_dtype, tile_rows=tile_rows)
    out_flat = out2.reshape(-1)
    if n_pad != n_total:
        out_flat = out_flat[:n_total]
    return out_flat.reshape(out_shape)


def _reference(loc, scale, z):
    var = scale ** 2
    return -0.5 * jnp.log(2 * jnp.pi * var) - (z - loc) ** 2 / (2 * var)


if __name__ == "__main__":
    key = jax.random.PRNGKey(0)
    k1, k2, k3, k4, k5, k6, k7 = jax.random.split(key, 7)

    batch, samples, hidden = 2, 8, 32

    # 1) Typical VAE usage: loc/scale broadcast over (batch, samples);
    #    lane-packing path (feat=32 -> g=4, L=128).
    loc = jax.random.normal(k1, (1, 1, hidden), dtype=jnp.float32)
    scale = jax.nn.softplus(
        jax.random.normal(k2, (1, 1, hidden), dtype=jnp.float32)) + 0.1
    z = jax.random.normal(k3, (batch, samples, hidden), dtype=jnp.float32)

    out = jax.block_until_ready(normal_log_prob(loc, scale, z))
    np.testing.assert_allclose(np.asarray(out),
                               np.asarray(_reference(loc, scale, z)),
                               rtol=1e-5, atol=1e-5)

    # 2) Multi-tile path: grid > 1, ragged last tile, (1, L) param block reuse.
    z_big = jax.random.normal(k4, (9, 4, hidden), dtype=jnp.float32)
    out_big = jax.block_until_ready(normal_log_prob(loc, scale, z_big, tile_rows=8))
    np.testing.assert_allclose(np.asarray(out_big),
                               np.asarray(_reference(loc, scale, z_big)),
                               rtol=1e-5, atol=1e-5)

    # 3) Feature-pad path: feat=48 not a 128 multiple, rows not divisible by g.
    loc48 = jax.random.normal(k5, (48,), dtype=jnp.float32)
    scale48 = jax.nn.softplus(
        jax.random.normal(k6, (48,), dtype=jnp.float32)) + 0.1
    z48 = jax.random.normal(k7, (5, 48), dtype=jnp.float32)
    out48 = jax.block_until_ready(normal_log_prob(loc48, scale48, z48))
    np.testing.assert_allclose(np.asarray(out48),
                               np.asarray(_reference(loc48, scale48, z48)),
                               rtol=1e-5, atol=1e-5)

    # 4) Fallback path: loc/scale carry the full shape (no broadcast structure).
    loc_full = jnp.broadcast_to(loc, z.shape)
    scale_full = jnp.broadcast_to(scale, z.shape)
    out_full = jax.block_until_ready(normal_log_prob(loc_full, scale_full, z))
    np.testing.assert_allclose(np.asarray(out_full),
                               np.asarray(_reference(loc_full, scale_full, z)),
                               rtol=1e-5, atol=1e-5)

    # 5) rows==1 / 1-D input with a scalar loc: padded flattened path.
    z1d = jax.random.normal(k4, (40,), dtype=jnp.float32)
    loc_s = jnp.float32(0.3)
    scale1d = jax.nn.softplus(jax.random.normal(k5, (40,), dtype=jnp.float32)) + 0.1
    out1d = jax.block_until_ready(normal_log_prob(loc_s, scale1d, z1d))
    np.testing.assert_allclose(np.asarray(out1d),
                               np.asarray(_reference(loc_s, scale1d, z1d)),
                               rtol=1e-5, atol=1e-5)

    print("KERNEL_OK")
</pallas_src>

<mosaic_0001>
module attributes {stable_mosaic.version = 11 : i64} {
  func.func @_normal_logprob_kernel(%arg0: i32, %arg1: memref<1x128xf32, #tpu.memory_space<vmem>>, %arg2: memref<1x128xf32, #tpu.memory_space<vmem>>, %arg3: memref<4x128xf32, #tpu.memory_space<vmem>>, %arg4: memref<4x128xf32, #tpu.memory_space<vmem>>) attributes {dimension_semantics = [#tpu.dimension_semantics<parallel>], iteration_bounds = array<i64: 1>, scalar_prefetch = 0 : i64, scratch_operands = 0 : i64, tpu.core_type = #tpu.core_type<tc>, window_params = [{pipeline_mode = #tpu.pipeline_mode<synchronous>, transform_indices = @transform_0, window_bounds = array<i64: 1, 128>}, {pipeline_mode = #tpu.pipeline_mode<synchronous>, transform_indices = @transform_1, window_bounds = array<i64: 1, 128>}, {transform_indices = @transform_2, window_bounds = array<i64: 4, 128>}, {transform_indices = @transform_3, window_bounds = array<i64: 4, 128>}]} {
    %c0 = arith.constant 0 : index
    %c0_0 = arith.constant 0 : index
    %0 = vector.load %arg1[%c0, %c0_0] : memref<1x128xf32, #tpu.memory_space<vmem>>, vector<1x128xf32>
    %c0_1 = arith.constant 0 : index
    %c0_2 = arith.constant 0 : index
    %1 = vector.load %arg2[%c0_1, %c0_2] : memref<1x128xf32, #tpu.memory_space<vmem>>, vector<1x128xf32>
    %c0_3 = arith.constant 0 : index
    %c0_4 = arith.constant 0 : index
    %2 = vector.load %arg3[%c0_3, %c0_4] : memref<4x128xf32, #tpu.memory_space<vmem>>, vector<4x128xf32>
    %3 = arith.mulf %1, %1 : vector<1x128xf32>
    %4 = math.log %3 : vector<1x128xf32>
    %cst = arith.constant 1.83787704 : f32
    %5 = vector.broadcast %cst : f32 to vector<1x128xf32>
    %6 = arith.addf %5, %4 : vector<1x128xf32>
    %cst_5 = arith.constant -5.000000e-01 : f32
    %7 = vector.broadcast %cst_5 : f32 to vector<1x128xf32>
    %8 = arith.mulf %7, %6 : vector<1x128xf32>
    %9 = tpu.reciprocal %3 : vector<1x128xf32> -> vector<1x128xf32>
    %cst_6 = arith.constant 5.000000e-01 : f32
    %10 = vector.broadcast %cst_6 : f32 to vector<1x128xf32>
    %11 = arith.mulf %10, %9 : vector<1x128xf32>
    %12 = vector.broadcast %0 : vector<1x128xf32> to vector<4x128xf32>
    %13 = arith.subf %2, %12 : vector<4x128xf32>
    %14 = arith.mulf %13, %13 : vector<4x128xf32>
    %15 = vector.broadcast %11 : vector<1x128xf32> to vector<4x128xf32>
    %16 = arith.mulf %14, %15 : vector<4x128xf32>
    %17 = vector.broadcast %8 : vector<1x128xf32> to vector<4x128xf32>
    %18 = arith.subf %17, %16 : vector<4x128xf32>
    %c0_7 = arith.constant 0 : index
    %c0_8 = arith.constant 0 : index
    %19 = vector.load %arg4[%c0_7, %c0_8] : memref<4x128xf32, #tpu.memory_space<vmem>>, vector<4x128xf32>
    tpu.vector_store %arg4[%c0_7, %c0_8], %18 {strides = array<i32>} : memref<4x128xf32, #tpu.memory_space<vmem>>, vector<4x128xf32>,
    return
  }
  func.func @transform_0(%arg0: i32) -> (i32, i32) {
    %c0_i32 = arith.constant 0 : i32
    %c0_i32_0 = arith.constant 0 : i32
    %c0_i32_1 = arith.constant 0 : i32
    return %c0_i32, %c0_i32_0 : i32, i32
  }
  func.func @transform_1(%arg0: i32) -> (i32, i32) {
    %c0_i32 = arith.constant 0 : i32
    %c0_i32_0 = arith.constant 0 : i32
    %c0_i32_1 = arith.constant 0 : i32
    return %c0_i32, %c0_i32_0 : i32, i32
  }
  func.func @transform_2(%arg0: i32) -> (i32, i32) {
    %c0_i32 = arith.constant 0 : i32
    %c0_i32_0 = arith.constant 0 : i32
    return %arg0, %c0_i32 : i32, i32
  }
  func.func @transform_3(%arg0: i32) -> (i32, i32) {
    %c0_i32 = arith.constant 0 : i32
    %c0_i32_0 = arith.constant 0 : i32
    return %arg0, %c0_i32 : i32, i32
  }
}

</mosaic_0001>

<bundles_post_ra>
// kernel: tpu_custom_call.1
= control target key start
LH: loop header
LB: loop body
LE: loop exit
PB: predicated region body
PF: predicated region fallthrough
CT: control target
= control target key end

     0   :  { %8 = vsyncpa [#allocation3], 0  ;;  %s182_s0 = inlined_call_operand.hbm [shape: f32[1,128], index: 0, kind: input, shape index: {}]   ;;  %s183_s1 = inlined_call_operand.vmem [shape: f32[1,128], index: 1, kind: input, shape index: {}]   ;;  %s184_s2 = inlined_call_operand.vmem [shape: f32[4,128], index: 2, kind: input, shape index: {}]   ;;  %s185_s3 = inlined_call_operand.hbm [shape: f32[4,128], index: 3, kind: output, shape index: {}]  }
   0x1   :  { %9 = vsyncpa [#allocation4], 0  ;;  %s130_s12 = smov [#allocation2]   ;;  %s82_s16 = scalar_lea.hbm %s182_s0, 16 }
   0x2   :  { %s16_s13 = sshll.u32 %s130_s12, 4  ;;  %p83_p0 = scmp.ne.s32.totalorder %s182_s0, %s82_s16  ;;  %s17_s13 = int_to_ptr.vmem [resolvable:$true] %s16_s13 }
   0x3   :  { %p86_p1 = scmp.lt.u32.totalorder %s82_s16, %s182_s0 }
   0x5   :  { %p88_p2 = pnand %p86_p1, %p83_p0 }
   0x7   :  { %91 = shalt.err (!%p88_p2)
}
   0x8   :  { %s92_s21 = scalar_lea.vmem %s17_s13, 16  ;;  %s96_s22 = scalar_lea.vmem %s17_s13, 32 }
   0x9   :  { %p93_p3 = scmp.ne.s32.totalorder %s17_s13, %s92_s21  ;;  %p97_p4 = scmp.lt.s32.totalorder %s17_s13, %s17_s13 }
   0xa   :  { %p98_p5 = scmp.lt.s32.totalorder %s96_s22, %s92_s21 }
   0xc   :  { %p99_p6 = por %p98_p5, %p97_p4 }
   0xe   :  { %p100_p7 = pnand %p99_p6, %p93_p3 }
  0x10   :  { %103 = shalt.err (!%p100_p7)
}
  0x11   :  { %19 = dma.hbm_to_vmem [thread:$0]  %s182_s0, 16, %s17_s13, [#allocation3]  }
  0x12   :  { %126 = dma.done.wait [#allocation3], 16  }
  0x13   :  { %127 = vsyncadd [#allocation3], 4294967280  ;;  %v28_v0 = vld [vmem:[%s183_s1] sm:$0x1]  ;;  %v46_v2 = vlaneseq  ;;  %v75_v3 = vld [vmem:[#allocation2] ss:$0 sm:$0xff] }
  0x14   :  { %v30_v1 = vmul.f32 %v28_v0, %v28_v0  ;;  %v29_v4 = vld [vmem:[%s184_s2] sm:$0xf]  ;;  %s131_s0 = smov [#allocation5]  }
  0x15   :  { %v47_v5 = vshrl.u32 %v46_v2, 7  ;;  %v43_v6 = vsub.f32 %v29_v4, %v75_v3  ;;  %s66_s1 = sshll.u32 %s131_s0, 4  ;;  %s67_s1 = int_to_ptr.vmem [resolvable:$true] %s66_s1 }
  0x16   :  { %78 = vlog2.f32 %v30_v1  ;;  %s104_s29 = scalar_lea.vmem %s67_s1, 64  ;;  %p109_p9 = scmp.lt.s32.totalorder %s67_s1, %s67_s1 }
  0x17   :  { %80 = vrcp.f32 %v30_v1  ;;  %v48_v8 = vsub.s32 0, %v47_v5  ;;  %v44_v12 = vmul.f32 %v43_v6, %v43_v6  ;;  %p105_p8 = scmp.ne.s32.totalorder %s67_s1, %s104_s29  ;;  %p110_p10 = scmp.lt.s32.totalorder %s104_s29, %s104_s29 }
  0x19   :  { %p111_p11 = por %p110_p10, %p109_p9 }
  0x1b   :  { %p112_p12 = pnand %p111_p11, %p105_p8 }
  0x20   :  { %v79_v7 = vpop.eup %78 }
  0x21   :  { %v81_v9 = vpop.eup %80  ;;  %v32_v10 = vmul.f32 0.6931472, %v79_v7 }
  0x22   :  { %v36_v11 = vmul.f32 0.5, %v81_v9 }
  0x23   :  { %v33_v13 = vadd.f32 1.837877, %v32_v10 }
  0x24   :  { %v49_v14 = vrot.slane %v36_v11, %v48_v8 }
  0x25   :  { %v34_v15 = vmul.f32 -0.5, %v33_v13 }
  0x26   :  { %v51_v16 = vmul.f32 %v49_v14, %v44_v12 }
  0x27   :  { %v56_v17 = vrot.slane %v34_v15, %v48_v8 }
  0x29   :  { %v58_v18 = vsub.f32 %v56_v17, %v51_v16 }
  0x2b   :  { %59 = vst [vmem:[#allocation5] sm:$0xf] %v58_v18 }
  0x2c   :  { %115 = shalt.err (!%p112_p12)
}
  0x2d   :  { %s116_s4 = scalar_lea.hbm %s185_s3, 64 }
  0x2e   :  { %p117_p13 = scmp.ne.s32.totalorder %s185_s3, %s116_s4  ;;  %p120_p0 = scmp.lt.u32.totalorder %s116_s4, %s185_s3 }
  0x30   :  { %p122_p1 = pnand %p120_p0, %p117_p13 }
  0x32   :  { %125 = shalt.err (!%p122_p1)
}
  0x33   :  { %69 = dma.vmem_to_hbm [thread:$0]  %s67_s1, 64, %s185_s3, [#allocation4]  }
  0x34   :  { %128 = dma.done.wait [#allocation4], 64  }
  0x35   :  { %129 = vsyncadd [#allocation4], 4294967232 }
  0x36   :  { %73 = vsyncpa [#allocation3], 1 }
  0x37   :  { %74 = vsyncpa [#allocation4], 1 }

</bundles_post_ra>
